<compile_context>
chip_gen: v7x
topology: tpu7x:2x2x1
jax: 0.10.0
libtpu: 0.0.40
codegen_flags: <defaults>
</compile_context>

<pallas_src>
import math

import jax
import jax.numpy as jnp
from jax.experimental import pallas as pl
from jax.experimental.pallas import tpu as pltpu


# ----------------------------------------------------------------------------- kernels


def _slab_kernel(pe_ref, x_ref, o_ref):
    # PE slab precomputed in XLA; pure streaming add (HBM-roofline bound).
    o_ref[...] = x_ref[...] + pe_ref[...]


def _make_kernel_lane(C, L):
    """In-kernel PE with the lane-periodic part (inv_freq / phase / lane//C) hoisted
    into a tiny (3, L) table computed once in the wrapper. Requires L % C == 0."""
    ratio = float(L // C)

    def kernel(tab_ref, x_ref, o_ref, pe_ref):
        # program_id must be read OUTSIDE pl.when bodies (interpret/CPU lowering).
        s = pl.program_id(0)
        b = pl.program_id(1)

        # NOTE: PE reuse relies on the batch axis being the innermost ("arbitrary") grid
        # axis so b == 0 is visited first for every sequence tile on each core.
        @pl.when(b == 0)
        def _():
            TR = pe_ref.shape[0]
            inv_freq = tab_ref[0:1, :]                     # (1, L)
            phase = tab_ref[1:2, :]                        # (1, L)  odd ch: cos = sin(+pi/2)
            pos_off = tab_ref[2:3, :]                      # (1, L)  lane // C
            row = jax.lax.broadcasted_iota(jnp.int32, (TR, L), 0).astype(jnp.float32)
            base = (s * TR).astype(jnp.float32)
            pos = (base + row) * ratio + pos_off           # sequence position per element
            pe_ref[...] = jnp.sin(pos * inv_freq + phase).astype(pe_ref.dtype)

        o_ref[...] = x_ref[...] + pe_ref[...]              # same dtype -> no per-step cast

    return kernel


def _make_kernel_general(C, L):
    """General in-kernel PE from the flat element index (any C)."""
    C_even = ((C + 1) // 2) * 2
    neg_scale = -math.log(10000.0) * 2.0 / float(C_even)
    half_pi = math.pi / 2.0

    def kernel(x_ref, o_ref, pe_ref):
        s = pl.program_id(0)
        b = pl.program_id(1)

        @pl.when(b == 0)
        def _():
            TR = pe_ref.shape[0]
            row = jax.lax.broadcasted_iota(jnp.int32, (TR, L), 0)
            lane = jax.lax.broadcasted_iota(jnp.int32, (TR, L), 1)
            flat = s * (TR * L) + row * L + lane           # flat index in one batch slice
            pos = (flat // C).astype(jnp.float32)
            c = flat % C
            pair = (c // 2).astype(jnp.float32)
            inv_freq = jnp.exp(neg_scale * pair)           # 1 / 10000 ** (2k / C_even)
            phase = (c & 1).astype(jnp.float32) * half_pi  # odd channels: cos = sin(+pi/2)
            pe_ref[...] = jnp.sin(pos * inv_freq + phase).astype(pe_ref.dtype)

        o_ref[...] = x_ref[...] + pe_ref[...]

    return kernel


# ----------------------------------------------------------------------------- wrapper


def _pe_slab(X, C, N, pad, R, L, dtype):
    """Full positional-encoding slab in the flattened lane-dense layout (x.dtype)."""
    C_even = ((C + 1) // 2) * 2
    inv_freq = 1.0 / (10000.0 ** (jnp.arange(0, C_even, 2, dtype=jnp.float32) / C_even))
    pos = jnp.arange(X, dtype=jnp.float32)
    sin_inp = pos[:, None] * inv_freq[None, :]
    emb = jnp.stack((jnp.sin(sin_inp), jnp.cos(sin_inp)), axis=-1).reshape(X, C_even)
    pe = emb[:, :C].astype(dtype).reshape(N)
    if pad:
        pe = jnp.pad(pe, (0, pad))
    return pe.reshape(R, L)


def _lane_tables(C, L):
    """(3, L) f32 table: inv_freq, phase, lane//C for the lane-hoisted kernel."""
    C_even = ((C + 1) // 2) * 2
    lane = jnp.arange(L, dtype=jnp.int32)
    c = lane % C
    pair = (c // 2).astype(jnp.float32)
    inv_freq = 1.0 / (10000.0 ** ((2.0 * pair) / float(C_even)))   # matches reference
    phase = (c % 2).astype(jnp.float32) * (math.pi / 2.0)
    pos_off = (lane // C).astype(jnp.float32)
    return jnp.stack([inv_freq, phase, pos_off], axis=0)


def sinusoid_add(x, *, vmem_budget_bytes=12 * 1024 * 1024, precompute_pe=None):
    """Pallas equivalent of Sinusoid(channels=x.shape[-1]).forward(x)['x']."""
    if x.ndim != 3:
        raise RuntimeError("The input tensor has to be 3d!")
    B, X, C = x.shape
    N = X * C
    if N > 2**31 - 1:
        raise ValueError("flat int32 indexing requires X * C < 2**31")
    # TODO(synk): positions are computed in float32; exact only for sequence lengths X < 2**24.

    if precompute_pe is None:
        precompute_pe = B <= 2                     # small batch: stream a precomputed PE slab

    itemsize = jnp.dtype(x.dtype).itemsize
    L = 128
    Np = -(-N // L) * L                            # pad flattened per-batch dim to lane-dense 128
    pad = Np - N
    R = Np // L

    # dtype-native sublane alignment: 8 rows (f32), 16 (bf16/f16), 32 (int8/fp8).
    align = max(8, 32 // max(1, itemsize))

    # Conservative live bytes / row: 2x in + 2x out (+ 2x PE slab) double buffers + PE scratch.
    per_row_bytes = L * itemsize * 6 + L * 4
    tr = max(1, int(vmem_budget_bytes // per_row_bytes))
    if R >= 2 * align:
        # v7x megacore: guarantee >= 2 sequence tiles so both TensorCores get work.
        half = -(-pl.cdiv(R, 2) // align) * align
        tr = min(tr, half)
    if tr >= R:
        TR = R                                     # single full-extent tile
    else:
        TR = max(align, (tr // align) * align)     # partial tiling must be sublane aligned
    num_tiles = pl.cdiv(R, TR)

    xf = x.reshape(B, N)
    if pad:
        xf = jnp.pad(xf, ((0, 0), (0, pad)))
    xf = xf.reshape(B, R, L)

    x_spec = pl.BlockSpec((None, TR, L), lambda s, b: (b, s, 0))
    out_spec = pl.BlockSpec((None, TR, L), lambda s, b: (b, s, 0))
    cparams = pltpu.CompilerParams(
        dimension_semantics=("parallel", "arbitrary"),
        vmem_limit_bytes=32 * 1024 * 1024,
    )
    out_shape = jax.ShapeDtypeStruct((B, R, L), x.dtype)

    if precompute_pe:
        pe = _pe_slab(X, C, N, pad, R, L, x.dtype)
        out = pl.pallas_call(
            _slab_kernel,
            out_shape=out_shape,
            grid_spec=pltpu.PrefetchScalarGridSpec(
                num_scalar_prefetch=0,
                grid=(num_tiles, B),               # batch innermost -> PE block re-DMA skipped
                in_specs=[pl.BlockSpec((TR, L), lambda s, b: (s, 0)), x_spec],
                out_specs=out_spec,
            ),
            compiler_params=cparams,
        )(pe, xf)
    elif L % C == 0:
        tab = _lane_tables(C, L)
        out = pl.pallas_call(
            _make_kernel_lane(C, L),
            out_shape=out_shape,
            grid_spec=pltpu.PrefetchScalarGridSpec(
                num_scalar_prefetch=0,
                grid=(num_tiles, B),               # batch innermost -> PE scratch reuse
                in_specs=[pl.BlockSpec((3, L), lambda s, b: (0, 0)), x_spec],
                out_specs=out_spec,
                scratch_shapes=[pltpu.VMEM((TR, L), x.dtype)],
            ),
            compiler_params=cparams,
        )(tab, xf)
    else:
        out = pl.pallas_call(
            _make_kernel_general(C, L),
            out_shape=out_shape,
            grid_spec=pltpu.PrefetchScalarGridSpec(
                num_scalar_prefetch=0,
                grid=(num_tiles, B),
                in_specs=[x_spec],
                out_specs=out_spec,
                scratch_shapes=[pltpu.VMEM((TR, L), x.dtype)],
            ),
            compiler_params=cparams,
        )(xf)

    out = out.reshape(B, Np)
    if pad:
        out = out[:, :N]
    return out.reshape(B, X, C)


# ----------------------------------------------------------------------------- reference


def _sinusoid_ref(x):
    """Pure-JAX reference mirroring the PyTorch module exactly."""
    B, X, orig_ch = x.shape
    channels = int(math.ceil(orig_ch / 2) * 2)
    inv_freq = 1.0 / (10000.0 ** (jnp.arange(0, channels, 2, dtype=jnp.float32) / channels))
    pos = jnp.arange(X, dtype=jnp.float32)
    sin_inp = jnp.einsum("i,j->ij", pos, inv_freq)
    emb = jnp.stack((jnp.sin(sin_inp), jnp.cos(sin_inp)), axis=-1).reshape(X, channels)
    penc = jnp.broadcast_to(emb.astype(x.dtype)[None, :, :orig_ch], x.shape)
    return penc + x


if __name__ == "__main__":
    key = jax.random.PRNGKey(0)
    cases = [
        (2, 8, 32),     # B<=2 -> precomputed PE slab, lane-dense, no padding
        (4, 16, 32),    # in-kernel PE, lane-hoisted tables (128 % 32 == 0)
        (6, 10, 20),    # in-kernel PE, general div/mod path + lane padding (N=200 -> 256)
        (3, 64, 128),   # in-kernel PE, lane-hoisted, 2 sequence tiles (multi-tile reuse)
    ]
    for i, shape in enumerate(cases):
        key, sub = jax.random.split(key)
        x = jax.random.normal(sub, shape, dtype=jnp.float32)
        out = jax.block_until_ready(sinusoid_add(x))
        ref = _sinusoid_ref(x)
        assert out.shape == x.shape, f"shape mismatch in case {i}"
        assert out.dtype == x.dtype, f"dtype mismatch in case {i}"
        assert jnp.allclose(out, ref, atol=1e-4, rtol=1e-4), f"value mismatch in case {i}"
    print("KERNEL_OK")
</pallas_src>

<mosaic_0001>
module attributes {stable_mosaic.version = 11 : i64} {
  func.func @_slab_kernel(%arg0: i32, %arg1: i32, %arg2: memref<2x128xf32, #tpu.memory_space<vmem>>, %arg3: memref<1x2x128xf32, #tpu.memory_space<vmem>>, %arg4: memref<1x2x128xf32, #tpu.memory_space<vmem>>) attributes {dimension_semantics = [#tpu.dimension_semantics<parallel>, #tpu.dimension_semantics<arbitrary>], iteration_bounds = array<i64: 1, 2>, scalar_prefetch = 0 : i64, scratch_operands = 0 : i64, tpu.core_type = #tpu.core_type<tc>, window_params = [{transform_indices = @transform_0, window_bounds = array<i64: 2, 128>}, {transform_indices = @transform_1, window_bounds = array<i64: 1, 2, 128>}, {transform_indices = @transform_2, window_bounds = array<i64: 1, 2, 128>}]} {
    %c0 = arith.constant 0 : index
    %c0_0 = arith.constant 0 : index
    %c0_1 = arith.constant 0 : index
    %0 = vector.load %arg3[%c0, %c0_0, %c0_1] : memref<1x2x128xf32, #tpu.memory_space<vmem>>, vector<1x2x128xf32>
    %1 = vector.shape_cast %0 : vector<1x2x128xf32> to vector<2x128xf32>
    %c0_2 = arith.constant 0 : index
    %c0_3 = arith.constant 0 : index
    %2 = vector.load %arg2[%c0_2, %c0_3] : memref<2x128xf32, #tpu.memory_space<vmem>>, vector<2x128xf32>
    %3 = arith.addf %1, %2 : vector<2x128xf32>
    %c0_4 = arith.constant 0 : index
    %c0_5 = arith.constant 0 : index
    %c0_6 = arith.constant 0 : index
    %4 = vector.load %arg4[%c0_4, %c0_5, %c0_6] : memref<1x2x128xf32, #tpu.memory_space<vmem>>, vector<1x2x128xf32>
    %5 = vector.shape_cast %4 : vector<1x2x128xf32> to vector<2x128xf32>
    %6 = vector.shape_cast %3 : vector<2x128xf32> to vector<1x2x128xf32>
    tpu.vector_store %arg4[%c0_4, %c0_5, %c0_6], %6 {strides = array<i32>} : memref<1x2x128xf32, #tpu.memory_space<vmem>>, vector<1x2x128xf32>,
    return
  }
  func.func @transform_0(%arg0: i32, %arg1: i32) -> (i32, i32) {
    %c0_i32 = arith.constant 0 : i32
    %c0_i32_0 = arith.constant 0 : i32
    return %arg0, %c0_i32 : i32, i32
  }
  func.func @transform_1(%arg0: i32, %arg1: i32) -> (i32, i32, i32) {
    %c0_i32 = arith.constant 0 : i32
    %c0_i32_0 = arith.constant 0 : i32
    return %arg1, %arg0, %c0_i32 : i32, i32, i32
  }
  func.func @transform_2(%arg0: i32, %arg1: i32) -> (i32, i32, i32) {
    %c0_i32 = arith.constant 0 : i32
    %c0_i32_0 = arith.constant 0 : i32
    return %arg1, %arg0, %c0_i32 : i32, i32, i32
  }
}

</mosaic_0001>

<bundles_post_ra>
// kernel: tpu_custom_call.1
= control target key start
LH: loop header
LB: loop body
LE: loop exit
PB: predicated region body
PF: predicated region fallthrough
CT: control target
= control target key end

     0   :  { %7 = vsyncpa [#allocation3], 0  ;;  %s777_s0 = inlined_call_operand.hbm [shape: f32[2,128], index: 0, kind: input, shape index: {}]   ;;  %s778_s1 = inlined_call_operand.hbm [shape: f32[2,2,128], index: 1, kind: input, shape index: {}]   ;;  %s779_s2 = inlined_call_operand.hbm [shape: f32[2,2,128], index: 2, kind: output, shape index: {}]  }
   0x1   :  { %8 = vsyncpa [#allocation6], 0 }
   0x2   :  { %10 = vsyncpa [#allocation6 + $0x1], 0 }
   0x3   :  { %11 = vsyncpa [#allocation4], 0 }
   0x4   :  { %13 = vsyncpa [#allocation4 + $0x1], 0  ;;  %s561_s9 = smov 0   ;;  %s563_s10 = smov 0  }
   0x5   :  { %s565_s11 = smov 0   ;;  %s567_s12 = smov 0  }
   0x6   :  { %s569_s13 = smov 0   ;;  %s571_s14 = smov 0  }
   0x7 LB: > { %s309_s15 = sadd.s32 4294967295, %s541_s14   ;;  %s310_s16 = sadd.s32 4294967294, %s541_s14   ;;  %s541_s14 = sphi %s571_s14, %s19_s14   ;;  %s537_s13 = sphi %s569_s13, %s804_s13   ;;  %s533_s12 = sphi %s567_s12, %s803_s12   ;;  %s529_s11 = sphi %s565_s11, %s802_s11   ;;  %s525_s10 = sphi %s563_s10, %s801_s10   ;;  %s521_s9 = sphi %s561_s9, %s800_s9  }
   0x8   : > { %p79_p0 = scmp.ne.s32.totalorder %s525_s10, %s521_s9  ;;  %p595_p1 = scmp.eq.s32.totalorder %s309_s15, 0 }
   0x9   : > { %p599_p2 = scmp.eq.s32.totalorder %s309_s15, 1  ;;  %p111_p3 = scmp.eq.s32.totalorder %s310_s16, 1 }
   0xa   : > { %s784_s17 = scalar_select %p595_p1, 1, 0 }
   0xb   : > { %s785_s18 = scalar_select %p599_p2, 1, 0 }
   0xc   : > { %p605_p4 = por %p595_p1, %p79_p0  ;;  %p311_p5 = scmp.ge.s32.totalorder %s541_s14, 1 }
   0xd   : > { %p610_p6 = por %p111_p3, %p79_p0  ;;  %p118_p7 = scmp.lt.s32.totalorder %s541_s14, 3 }
   0xe   : > { %s786_s19 = scalar_select %p605_p4, 1, 0 }
   0xf   : > { %s787_s20 = scalar_select %p610_p6, 1, 0 }
  0x10   : > { %p615_p8 = pnand %p311_p5, %p118_p7  ;;  %s543_s22 = smov [#allocation2]  }
  0x11   : > { %s133_s23 = sshll.u32 %s543_s22, 4  ;;  %s28_s25 = sadd.s32 1, %s537_s13  ;;  %s134_s23 = int_to_ptr.vmem [resolvable:$true] %s133_s23 }
  0x12   : > { %s788_s21 = scalar_select %p615_p8, 1, 0 }
  0x13   : > { %p332_p10 = pneg %p615_p8  ;;  %s66_s26 = sadd.s32 1, %s529_s11 }
  0x14   : > { %p630_p12 = scmp.ge.s32.totalorder %s28_s25, 2  ;;  %s397_s30 = scalar_lea.hbm %s777_s0, 32 }
  0x15   : > { %p624_p11 = pnand %p332_p10, %p595_p1  ;;  %p398_p13 = scmp.ne.s32.totalorder %s777_s0, %s397_s30 }
  0x16   : > { %s790_s27 = scalar_select %p630_p12, 1, 0 }
  0x17   : > { %p399_p0 = pneg %p624_p11  ;;  %p404_p7 = scmp.lt.u32.totalorder %s397_s30, %s777_s0 }
  0x19   : > { %p400_p3 = pnand %p399_p0, %p398_p13 }
  0x1b   : > { %p401_p5 = pneg %p400_p3 }
  0x1d   : > { %p406_p10 = pnand %p404_p7, %p401_p5 }
  0x1f   : > { %409 = shalt.err (!%p406_p10)
}
  0x20   : > { %s410_s7 = scalar_lea.vmem %s134_s23, 32  ;;  %p418_p1 = scmp.lt.s32.totalorder %s134_s23, %s134_s23 }
  0x21   : > { %p411_p9 = scmp.ne.s32.totalorder %s134_s23, %s410_s7  ;;  %p419_p8 = scmp.lt.s32.totalorder %s410_s7, %s410_s7 }
  0x23   : > { %p413_p6 = pnand %p411_p9, %p399_p0  ;;  %p420_p2 = por %p419_p8, %p418_p1 }
  0x25   : > { %p414_p4 = pneg %p413_p6 }
  0x27   : > { %p421_p12 = pnand %p420_p2, %p414_p4 }
  0x29   : > { %424 = shalt.err (!%p421_p12)
}
  0x2a   : > { %335 = dma.hbm_to_vmem [thread:$0]  (!%p624_p11), %s777_s0, 32, %s134_s23, [#allocation3]  }
  0x2b   : > { %p791_p1 = scmp.ne.s32.totalorder %s790_s27, 0  ;;  %p73_p2 = scmp.ne.s32.totalorder %s529_s11, %s525_s10 }
  0x2c   : > { %p74_p4 = scmp.eq.s32.totalorder %s541_s14, 0  ;;  %p345_p6 = scmp.lt.s32.totalorder %s541_s14, 2 }
  0x2d   : > { %s806_s25 = smov (%p791_p1, %s28_s25), 0  ;;  %p792_p12 = scmp.ne.s32.totalorder %s785_s18, 0 }
  0x2e   : > { %s61_s16 = ssub.s32 %s537_s13, %s806_s25  ;;  %p75_p9 = por %p74_p4, %p73_p2 }
  0x2f   : > { %p64_p8 = scmp.eq.s32.totalorder %s61_s16, 0  ;;  %p662_p13 = por %p792_p12, %p73_p2 }
  0x30   : > { %s144_s24 = sand.u32 1, %s529_s11   ;;  %s315_s27 = sshll.u32 %s537_s13, 5 }
  0x31   : > { %s670_s28 = scalar_select %p64_p8, %s529_s11, %s66_s26  }
  0x32   : > { %s314_s23 = sshll.u32 %s144_s24, 1  ;;  %s676_s3 = scalar_lea.hbm %s778_s1, %s315_s27 }
  0x33   : > { %s148_s18 = scalar_lea.vmem [#allocation5], %s314_s23  ;;  %p680_p11 = pnand %p345_p6, %p75_p9 }
  0x34   : > { %s156_s4 = sshll.u32 %s148_s18, 4  ;;  %s145_s26 = scalar_lea.sflag [#allocation6], %s144_s24  ;;  %s678_s4 = int_to_ptr.vmem [resolvable:$true] %s156_s4 }
  0x35   : > { %s425_s6 = scalar_lea.hbm %s676_s3, 32  ;;  %p427_p3 = pneg %p680_p11 }
  0x36   : > { %p426_p0 = scmp.ne.s32.totalorder %s676_s3, %s425_s6  ;;  %s430_s15 = scalar_lea.hbm %s778_s1, 64 }
  0x37   : > { %p431_p10 = scmp.lt.u32.totalorder %s676_s3, %s778_s1  ;;  %p432_p1 = scmp.lt.u32.totalorder %s430_s15, %s425_s6 }
  0x38   : > { %p428_p5 = pnand %p427_p3, %p426_p0  ;;  %p434_p4 = scmp.lt.u32.totalorder %s425_s6, %s676_s3 }
  0x39   : > { %p433_p2 = por %p432_p1, %p431_p10 }
  0x3a   : > { %p429_p7 = pneg %p428_p5 }
  0x3b   : > { %p435_p6 = por %p434_p4, %p433_p2 }
  0x3d   : > { %p436_p8 = pnand %p435_p6, %p429_p7 }
  0x3f   : > { %439 = shalt.err (!%p436_p8)
}
  0x40   : > { %s440_s24 = scalar_lea.vmem %s678_s4, 32  ;;  %s544_s27 = smov [#allocation5]  }
  0x41   : > { %p441_p9 = scmp.ne.s32.totalorder %s678_s4, %s440_s24  ;;  %s445_s29 = sshll.u32 %s544_s27, 4  ;;  %s446_s29 = int_to_ptr.vmem [resolvable:$false] %s445_s29 }
  0x42   : > { %s447_s30 = scalar_lea.vmem %s446_s29, 64  ;;  %p448_p5 = scmp.lt.s32.totalorder %s678_s4, %s446_s29 }
  0x43   : > { %p443_p12 = pnand %p441_p9, %p427_p3  ;;  %p449_p10 = scmp.lt.s32.totalorder %s447_s30, %s440_s24 }
  0x45   : > { %p444_p0 = pneg %p443_p12  ;;  %p450_p1 = por %p449_p10, %p448_p5 }
  0x47   : > { %p451_p2 = pnand %p450_p1, %p444_p0 }
  0x49   : > { %454 = shalt.err (!%p451_p2)
}
  0x4a   : > { %339 = dma.hbm_to_vmem [thread:$0]  (!%p680_p11), %s676_s3, 32, %s678_s4, %s145_s26  }
  0x4b   : > { %p795_p7 = scmp.ne.s32.totalorder %s788_s21, 0 }
  0x4c   : > { %p796_p3 = scmp.ne.s32.totalorder (!%p795_p7), %s784_s17, 0 }
  0x4d   : > { %165 = sbr.rel (%p795_p7) target bundleno = 114 (0x72), region = 28 }
  0x54   : > { %508 = dma.done.wait (%p796_p3), [#allocation3], 32  }
  0x55   : > { %510 = vsyncadd (%p796_p3), [#allocation3], 4294967264  ;;  %s716_s18 = sand.u32 1, %s525_s10   ;;  %p797_p4 = scmp.ne.s32.totalorder %s786_s19, 0 }
  0x56   : > { %s318_s6 = sshll.u32 %s716_s18, 1  ;;  %s172_s5 = scalar_lea.sflag [#allocation6], %s716_s18 }
  0x57   : > { %s175_s7 = scalar_lea.vmem [#allocation5], %s318_s6 }
  0x58   : > { %512 = dma.done.wait (%p797_p4), %s172_s5, 32  }
  0x59   : > { %514 = vsyncadd (%p797_p4), %s172_s5, 4294967264  ;;  %s195_s21 = scalar_lea.vmem [#allocation7], %s318_s6  ;;  %s321_s3 = sshll.u32 %s533_s12, 5  ;;  %v196_v0 = vld [vmem:[%s175_s7] sm:$0x3] }
  0x5a   : > { %s215_s17 = sshll.u32 %s195_s21, 4  ;;  %v197_v1 = vld [vmem:[#allocation2] sm:$0x3]  ;;  %s730_s8 = scalar_lea.hbm %s779_s2, %s321_s3  ;;  %s725_s17 = int_to_ptr.vmem [resolvable:$true] %s215_s17 }
  0x5b   : > { %v198_v2 = vadd.f32 %v197_v1, %v196_v0  ;;  %s201_s19 = scalar_lea.sflag [#allocation4], %s716_s18  ;;  %s455_s15 = scalar_lea.vmem %s725_s17, 32 }
  0x5c   : > { %p456_p11 = scmp.ne.s32.totalorder %s725_s17, %s455_s15  ;;  %s545_s12 = smov [#allocation7]  }
  0x5d   : > { %199 = vst [vmem:[%s195_s21] sm:$0x3] %v198_v2  ;;  %s459_s16 = sshll.u32 %s545_s12, 4  ;;  %s460_s16 = int_to_ptr.vmem [resolvable:$false] %s459_s16 }
  0x5e   : > { %p457_p6 = pnand %p456_p11, %p662_p13  ;;  %s461_s23 = scalar_lea.vmem %s460_s16, 64 }
  0x5f   : > { %p462_p9 = scmp.lt.s32.totalorder %s725_s17, %s460_s16  ;;  %p463_p12 = scmp.lt.s32.totalorder %s461_s23, %s455_s15 }
  0x60   : > { %p458_p8 = pneg %p457_p6 }
  0x61   : > { %p464_p0 = por %p463_p12, %p462_p9 }
  0x63   : > { %p465_p5 = pnand %p464_p0, %p458_p8 }
  0x65   : > { %468 = shalt.err (!%p465_p5)
}
  0x66   : > { %s469_s24 = scalar_lea.hbm %s730_s8, 32  ;;  %s473_s30 = scalar_lea.hbm %s779_s2, 64 }
  0x67   : > { %p470_p10 = scmp.ne.s32.totalorder %s730_s8, %s469_s24  ;;  %p474_p7 = scmp.lt.u32.totalorder %s730_s8, %s779_s2 }
  0x68   : > { %p475_p3 = scmp.lt.u32.totalorder %s473_s30, %s469_s24  ;;  %p477_p11 = scmp.lt.u32.totalorder %s469_s24, %s730_s8 }
  0x69   : > { %p471_p1 = pnand %p470_p10, %p662_p13 }
  0x6a   : > { %p476_p4 = por %p475_p3, %p474_p7 }
  0x6b   : > { %p472_p2 = pneg %p471_p1 }
  0x6c   : > { %p478_p6 = por %p477_p11, %p476_p4 }
  0x6e   : > { %p479_p8 = pnand %p478_p6, %p472_p2 }
  0x70   : > { %482 = shalt.err (!%p479_p8)
}
  0x71   : > { %330 = dma.vmem_to_hbm [thread:$0]  (%p662_p13), %s725_s17, 32, %s730_s8, %s201_s19  }
  0x72 PF: > { %s227_s5 = sand.u32 1, %s521_s9   ;;  %p798_p9 = scmp.ne.s32.totalorder %s787_s20, 0 }
  0x73   : > { %p799_p12 = scmp.ge.s32.totalorder %s541_s14, 2  ;;  %s228_s7 = scalar_lea.sflag [#allocation4], %s227_s5 }
  0x75   : > { %p341_p0 = pnand %p799_p12, %p798_p9 }
  0x77   : > { %516 = dma.done.wait (!%p341_p0), %s228_s7, 32  }
  0x78   : > { %518 = vsyncadd (!%p341_p0), %s228_s7, 4294967264  ;;  %s19_s14 = sadd.s32 1, %s541_s14   ;;  %s800_s9 = smov %s525_s10 }
  0x79   : > { %p16_p5 = scmp.ge.s32.totalorder %s19_s14, 4   ;;  %s801_s10 = smov %s529_s11 }
  0x7a   : > { %s802_s11 = smov %s670_s28  ;;  %s803_s12 = smov %s537_s13 }
  0x7b   : > { %s804_s13 = smov %s806_s25  ;;  %18 = sbr.rel (!%p16_p5) target bundleno = 7 (0x7), region = 79 }
  0x82   :  { %233 = vsyncpa [#allocation3], 1 }
  0x83   :  { %235 = vsyncpa [#allocation3 + $0x1], 1 }
  0x84   :  { %236 = vsyncpa [#allocation6], 1 }
  0x85   :  { %238 = vsyncpa [#allocation6 + $0x1], 1 }
  0x86   :  { %239 = vsyncpa [#allocation4], 1 }
  0x87   :  { %241 = vsyncpa [#allocation4 + $0x1], 1 }

</bundles_post_ra>
